<compile_context>
chip_gen: v7x
topology: tpu7x:2x2x1
jax: 0.10.0
libtpu: 0.0.40
codegen_flags: <defaults>
</compile_context>

<pallas_src>
import jax
import jax.numpy as jnp
from jax.experimental import pallas as pl
from jax.experimental.pallas import tpu as pltpu

TAU = 1.0          # module default; the reduced softmax form assumes tau == 1
EPS = 1e-20


def _i32(c):
    # Wrap a 32-bit (possibly unsigned) literal into an int32 constant,
    # preserving the bit pattern.
    c &= 0xFFFFFFFF
    if c >= 0x80000000:
        c -= 1 << 32
    return jnp.int32(c)


def _lsr(h, n):
    # Logical right shift on int32: arithmetic shift + mask off the sign fill.
    return (h >> n) & ((1 << (32 - n)) - 1)


def _mix32(h):
    # lowbias32-style integer finalizer (bit-identical to the uint32 version).
    h = h ^ _lsr(h, 16)
    h = h * _i32(0x7FEB352D)
    h = h ^ _lsr(h, 15)
    h = h * _i32(0x846CA68B)
    h = h ^ _lsr(h, 16)
    return h


def _uniform_noise(seed, tile_idx, shape, tiled_axis):
    """Counter-based Uniform[0,1) noise, unique per (seed, global element)."""
    r = jax.lax.broadcasted_iota(jnp.int32, shape, 0)
    c = jax.lax.broadcasted_iota(jnp.int32, shape, 1)
    if tiled_axis == 0:
        r = r + tile_idx * shape[0]
    else:
        c = c + tile_idx * shape[1]
    h = _mix32(seed + c * _i32(0x9E3779B1))
    h = _mix32(h ^ (r * _i32(0x85EBCA77)))
    # 24 random bits -> Uniform[0, 1) in f32.
    return _lsr(h, 8).astype(jnp.float32) * jnp.float32(1.0 / (1 << 24))


def _gumbel_softmax_lane_kernel(seed_ref, x_ref, o_ref):
    # Natural layout: block (TR, W); softmax over axis 1 (128-wide lane axis).
    i = pl.program_id(0)
    x = x_ref[...].astype(jnp.float32)
    u = _uniform_noise(seed_ref[0], i, x.shape, tiled_axis=0)
    nlu = -jnp.log(u + EPS) + EPS                     # in [~6e-8, ~46.1], > 0
    m = jnp.max(x, axis=1, keepdims=True)
    num = jnp.exp(x - m) * pl.reciprocal(nlu, approx=True)
    denom = jnp.sum(num, axis=1, keepdims=True)       # >= 1/46.1 > 0
    o_ref[...] = (num * pl.reciprocal(denom)).astype(o_ref.dtype)


def _gumbel_softmax_sublane_kernel(seed_ref, x_ref, o_ref):
    # Transposed layout: block (W, TL); softmax over axis 0 (sublane axis).
    i = pl.program_id(0)
    x = x_ref[...].astype(jnp.float32)
    u = _uniform_noise(seed_ref[0], i, x.shape, tiled_axis=1)
    nlu = -jnp.log(u + EPS) + EPS
    m = jnp.max(x, axis=0, keepdims=True)
    num = jnp.exp(x - m) * pl.reciprocal(nlu, approx=True)
    denom = jnp.sum(num, axis=0, keepdims=True)
    o_ref[...] = (num * pl.reciprocal(denom)).astype(o_ref.dtype)


def internal_attention(x, seed=0):
    """BinarySoftmax(tau=1.0) over the last axis of x (InternalAttention.forward)."""
    orig_shape = x.shape
    orig_dtype = x.dtype
    w = orig_shape[-1]
    rows = 1
    for s in orig_shape[:-1]:
        rows *= s

    x2d = x.reshape(rows, w)
    seed_arr = jnp.asarray([seed], dtype=jnp.int32)
    params = pltpu.CompilerParams(
        dimension_semantics=("parallel",),
        vmem_limit_bytes=32 * 1024 * 1024,
    )

    if w % 128 == 0:
        # ---- lane-softmax path: softmax axis is already lane-dense ----------
        tr_cap = max(8, ((2 << 20) // (w * 4)) // 8 * 8)       # ~2 MiB blocks
        rows8 = ((rows + 7) // 8) * 8
        tr = min(tr_cap, rows8)
        rows_p = ((rows + tr - 1) // tr) * tr
        xp = jnp.pad(x2d, ((0, rows_p - rows), (0, 0))) if rows_p != rows else x2d
        n = rows_p * w

        out = pl.pallas_call(
            _gumbel_softmax_lane_kernel,
            out_shape=jax.ShapeDtypeStruct((rows_p, w), orig_dtype),
            grid_spec=pltpu.PrefetchScalarGridSpec(
                num_scalar_prefetch=1,
                grid=(rows_p // tr,),
                in_specs=[pl.BlockSpec((tr, w), lambda i, seed: (i, 0))],
                out_specs=pl.BlockSpec((tr, w), lambda i, seed: (i, 0)),
            ),
            compiler_params=params,
            cost_estimate=pl.CostEstimate(
                flops=30 * n,
                transcendentals=3 * n,
                bytes_accessed=2 * n * x.dtype.itemsize,
            ),
        )(seed_arr, xp)
        out2d = out[:rows]
    else:
        # ---- sublane-softmax path: put rows on the 128-lane axis ------------
        xt = x2d.T                                             # (w, rows)
        tl_cap = max(128, ((2 << 20) // (max(w, 1) * 4)) // 128 * 128)
        rows128 = ((rows + 127) // 128) * 128
        tl = min(tl_cap, rows128)
        rows_p = ((rows + tl - 1) // tl) * tl
        if rows_p != rows:
            xt = jnp.pad(xt, ((0, 0), (0, rows_p - rows)))
        n = rows_p * w

        out_t = pl.pallas_call(
            _gumbel_softmax_sublane_kernel,
            out_shape=jax.ShapeDtypeStruct((w, rows_p), orig_dtype),
            grid_spec=pltpu.PrefetchScalarGridSpec(
                num_scalar_prefetch=1,
                grid=(rows_p // tl,),
                in_specs=[pl.BlockSpec((w, tl), lambda i, seed: (0, i))],
                out_specs=pl.BlockSpec((w, tl), lambda i, seed: (0, i)),
            ),
            compiler_params=params,
            cost_estimate=pl.CostEstimate(
                flops=30 * n,
                transcendentals=3 * n,
                bytes_accessed=2 * n * x.dtype.itemsize,
            ),
        )(seed_arr, xt)
        out2d = out_t[:, :rows].T

    return out2d.reshape(orig_shape)


def _check(out, x):
    row_sums = jnp.sum(out, axis=-1)
    assert out.shape == x.shape
    assert bool(jnp.all(jnp.isfinite(out)))
    assert bool(jnp.all(out >= 0.0))
    assert bool(jnp.all(jnp.abs(row_sums - 1.0) < 1e-3))


if __name__ == "__main__":
    # InternalAttention(d_model, dim_feedforward) has no learned parameters;
    # its forward is exactly the gumbel-softmax above.
    key = jax.random.PRNGKey(0)
    k1, k2 = jax.random.split(key)

    # Shape implied by TransformerLayer / MambaLayer: (batch, seq, d_model=128).
    x = jax.random.normal(k1, (2, 16, 128), dtype=jnp.float32)
    out = jax.block_until_ready(internal_attention(x, seed=0))
    _check(out, x)

    # Also exercise the small-last-dim (transposed / sublane-softmax) path.
    x2 = jax.random.normal(k2, (2, 4, 16, 16), dtype=jnp.float32)
    out2 = jax.block_until_ready(internal_attention(x2, seed=1))
    _check(out2, x2)

    print("KERNEL_OK")
</pallas_src>

<mosaic_0001>
module attributes {stable_mosaic.version = 11 : i64} {
  func.func @_gumbel_softmax_lane_kernel(%arg0: i32, %arg1: memref<1xi32, #tpu.memory_space<smem>>, %arg2: memref<32x128xf32, #tpu.memory_space<vmem>>, %arg3: memref<32x128xf32, #tpu.memory_space<vmem>>) attributes {dimension_semantics = [#tpu.dimension_semantics<parallel>], iteration_bounds = array<i64: 1>, scalar_prefetch = 1 : i64, scratch_operands = 0 : i64, tpu.core_type = #tpu.core_type<tc>, window_params = [{transform_indices = @transform_0, window_bounds = array<i64: 32, 128>}, {transform_indices = @transform_1, window_bounds = array<i64: 32, 128>}]} {
    %c0 = arith.constant 0 : index
    %c0_0 = arith.constant 0 : index
    %0 = vector.load %arg2[%c0, %c0_0] : memref<32x128xf32, #tpu.memory_space<vmem>>, vector<32x128xf32>
    %c0_1 = arith.constant 0 : index
    %1 = memref.load %arg1[%c0_1] : memref<1xi32, #tpu.memory_space<smem>>
    %2 = tpu.iota {dimensions = array<i32: 0>} : vector<32x128xi32>
    %3 = tpu.iota {dimensions = array<i32: 1>} : vector<32x128xi32>
    %c32_i32 = arith.constant 32 : i32
    %4 = arith.muli %arg0, %c32_i32 : i32
    %5 = vector.broadcast %4 : i32 to vector<32x128xi32>
    %6 = arith.addi %2, %5 : vector<32x128xi32>
    %c-1640531535_i32 = arith.constant -1640531535 : i32
    %7 = vector.broadcast %c-1640531535_i32 : i32 to vector<32x128xi32>
    %8 = arith.muli %3, %7 : vector<32x128xi32>
    %9 = vector.broadcast %1 : i32 to vector<32x128xi32>
    %10 = arith.addi %9, %8 : vector<32x128xi32>
    %c16_i32 = arith.constant 16 : i32
    %11 = vector.broadcast %c16_i32 : i32 to vector<32x128xi32>
    %12 = arith.shrsi %10, %11 : vector<32x128xi32>
    %c65535_i32 = arith.constant 65535 : i32
    %13 = vector.broadcast %c65535_i32 : i32 to vector<32x128xi32>
    %14 = arith.andi %12, %13 : vector<32x128xi32>
    %15 = arith.xori %10, %14 : vector<32x128xi32>
    %c2146121005_i32 = arith.constant 2146121005 : i32
    %16 = vector.broadcast %c2146121005_i32 : i32 to vector<32x128xi32>
    %17 = arith.muli %15, %16 : vector<32x128xi32>
    %c15_i32 = arith.constant 15 : i32
    %18 = vector.broadcast %c15_i32 : i32 to vector<32x128xi32>
    %19 = arith.shrsi %17, %18 : vector<32x128xi32>
    %c131071_i32 = arith.constant 131071 : i32
    %20 = vector.broadcast %c131071_i32 : i32 to vector<32x128xi32>
    %21 = arith.andi %19, %20 : vector<32x128xi32>
    %22 = arith.xori %17, %21 : vector<32x128xi32>
    %c-2073254261_i32 = arith.constant -2073254261 : i32
    %23 = vector.broadcast %c-2073254261_i32 : i32 to vector<32x128xi32>
    %24 = arith.muli %22, %23 : vector<32x128xi32>
    %c16_i32_2 = arith.constant 16 : i32
    %25 = vector.broadcast %c16_i32_2 : i32 to vector<32x128xi32>
    %26 = arith.shrsi %24, %25 : vector<32x128xi32>
    %c65535_i32_3 = arith.constant 65535 : i32
    %27 = vector.broadcast %c65535_i32_3 : i32 to vector<32x128xi32>
    %28 = arith.andi %26, %27 : vector<32x128xi32>
    %29 = arith.xori %24, %28 : vector<32x128xi32>
    %c-2048144777_i32 = arith.constant -2048144777 : i32
    %30 = vector.broadcast %c-2048144777_i32 : i32 to vector<32x128xi32>
    %31 = arith.muli %6, %30 : vector<32x128xi32>
    %32 = arith.xori %29, %31 : vector<32x128xi32>
    %c16_i32_4 = arith.constant 16 : i32
    %33 = vector.broadcast %c16_i32_4 : i32 to vector<32x128xi32>
    %34 = arith.shrsi %32, %33 : vector<32x128xi32>
    %c65535_i32_5 = arith.constant 65535 : i32
    %35 = vector.broadcast %c65535_i32_5 : i32 to vector<32x128xi32>
    %36 = arith.andi %34, %35 : vector<32x128xi32>
    %37 = arith.xori %32, %36 : vector<32x128xi32>
    %c2146121005_i32_6 = arith.constant 2146121005 : i32
    %38 = vector.broadcast %c2146121005_i32_6 : i32 to vector<32x128xi32>
    %39 = arith.muli %37, %38 : vector<32x128xi32>
    %c15_i32_7 = arith.constant 15 : i32
    %40 = vector.broadcast %c15_i32_7 : i32 to vector<32x128xi32>
    %41 = arith.shrsi %39, %40 : vector<32x128xi32>
    %c131071_i32_8 = arith.constant 131071 : i32
    %42 = vector.broadcast %c131071_i32_8 : i32 to vector<32x128xi32>
    %43 = arith.andi %41, %42 : vector<32x128xi32>
    %44 = arith.xori %39, %43 : vector<32x128xi32>
    %c-2073254261_i32_9 = arith.constant -2073254261 : i32
    %45 = vector.broadcast %c-2073254261_i32_9 : i32 to vector<32x128xi32>
    %46 = arith.muli %44, %45 : vector<32x128xi32>
    %c16_i32_10 = arith.constant 16 : i32
    %47 = vector.broadcast %c16_i32_10 : i32 to vector<32x128xi32>
    %48 = arith.shrsi %46, %47 : vector<32x128xi32>
    %c65535_i32_11 = arith.constant 65535 : i32
    %49 = vector.broadcast %c65535_i32_11 : i32 to vector<32x128xi32>
    %50 = arith.andi %48, %49 : vector<32x128xi32>
    %51 = arith.xori %46, %50 : vector<32x128xi32>
    %c8_i32 = arith.constant 8 : i32
    %52 = vector.broadcast %c8_i32 : i32 to vector<32x128xi32>
    %53 = arith.shrsi %51, %52 : vector<32x128xi32>
    %c16777215_i32 = arith.constant 16777215 : i32
    %54 = vector.broadcast %c16777215_i32 : i32 to vector<32x128xi32>
    %55 = arith.andi %53, %54 : vector<32x128xi32>
    %56 = arith.sitofp %55 : vector<32x128xi32> to vector<32x128xf32>
    %cst = arith.constant 5.96046448E-8 : f32
    %57 = vector.broadcast %cst : f32 to vector<32x128xf32>
    %58 = arith.mulf %56, %57 : vector<32x128xf32>
    %cst_12 = arith.constant 9.99999968E-21 : f32
    %59 = vector.broadcast %cst_12 : f32 to vector<32x128xf32>
    %60 = arith.addf %58, %59 : vector<32x128xf32>
    %61 = math.log %60 : vector<32x128xf32>
    %cst_13 = arith.constant 0.000000e+00 : f32
    %62 = vector.broadcast %cst_13 : f32 to vector<32x128xf32>
    %63 = arith.subf %62, %61 : vector<32x128xf32>
    %cst_14 = arith.constant 9.99999968E-21 : f32
    %64 = vector.broadcast %cst_14 : f32 to vector<32x128xf32>
    %65 = arith.addf %63, %64 : vector<32x128xf32>
    %cst_15 = arith.constant dense<0xFF800000> : vector<32xf32>
    %66 = vector.multi_reduction <maximumf>, %0, %cst_15 [1] : vector<32x128xf32> to vector<32xf32>
    %67 = vector.shape_cast %66 : vector<32xf32> to vector<32x1xf32>
    %68 = vector.broadcast %67 : vector<32x1xf32> to vector<32x128xf32>
    %69 = arith.subf %0, %68 : vector<32x128xf32>
    %70 = math.exp %69 : vector<32x128xf32>
    %71 = tpu.reciprocal %65 {approx = true} : vector<32x128xf32> -> vector<32x128xf32>
    %72 = arith.mulf %70, %71 : vector<32x128xf32>
    %cst_16 = arith.constant dense<0.000000e+00> : vector<32xf32>
    %73 = vector.multi_reduction <add>, %72, %cst_16 [1] : vector<32x128xf32> to vector<32xf32>
    %74 = vector.shape_cast %73 : vector<32xf32> to vector<32x1xf32>
    %75 = tpu.reciprocal %74 : vector<32x1xf32> -> vector<32x1xf32>
    %76 = vector.broadcast %75 : vector<32x1xf32> to vector<32x128xf32>
    %77 = arith.mulf %72, %76 : vector<32x128xf32>
    %c0_17 = arith.constant 0 : index
    %c0_18 = arith.constant 0 : index
    %78 = vector.load %arg3[%c0_17, %c0_18] : memref<32x128xf32, #tpu.memory_space<vmem>>, vector<32x128xf32>
    tpu.vector_store %arg3[%c0_17, %c0_18], %77 {strides = array<i32>} : memref<32x128xf32, #tpu.memory_space<vmem>>, vector<32x128xf32>,
    return
  }
  func.func @transform_0(%arg0: i32, %arg1: memref<1xi32, #tpu.memory_space<smem>>) -> (i32, i32) {
    %c0_i32 = arith.constant 0 : i32
    %c0_i32_0 = arith.constant 0 : i32
    return %arg0, %c0_i32 : i32, i32
  }
  func.func @transform_1(%arg0: i32, %arg1: memref<1xi32, #tpu.memory_space<smem>>) -> (i32, i32) {
    %c0_i32 = arith.constant 0 : i32
    %c0_i32_0 = arith.constant 0 : i32
    return %arg0, %c0_i32 : i32, i32
  }
}

</mosaic_0001>

<bundles_post_ra>
// kernel: tpu_custom_call.1
= control target key start
LH: loop header
LB: loop body
LE: loop exit
PB: predicated region body
PF: predicated region fallthrough
CT: control target
= control target key end

     0   :  { %8 = vsyncpa [#allocation5], 0  ;;  %s381_s0 = inlined_call_operand.<no memory space> [shape: s32[1], index: 0, kind: input, shape index: {}]   ;;  %s382_s1 = inlined_call_operand.hbm [shape: f32[32,128], index: 1, kind: input, shape index: {}]   ;;  %s383_s2 = inlined_call_operand.hbm [shape: f32[32,128], index: 2, kind: output, shape index: {}]  }
   0x1   :  { %9 = vsyncpa [#allocation6], 0  ;;  %s313_s9 = smov [#allocation4]   ;;  %s265_s13 = scalar_lea.hbm %s382_s1, 512 }
   0x2   :  { %s15_s10 = sshll.u32 %s313_s9, 4  ;;  %p266_p0 = scmp.ne.s32.totalorder %s382_s1, %s265_s13  ;;  %s16_s10 = int_to_ptr.vmem [resolvable:$true] %s15_s10 }
   0x3   :  { %p269_p1 = scmp.lt.u32.totalorder %s265_s13, %s382_s1 }
   0x5   :  { %p271_p2 = pnand %p269_p1, %p266_p0 }
   0x7   :  { %274 = shalt.err (!%p271_p2)
}
   0x8   :  { %s275_s18 = scalar_lea.vmem %s16_s10, 512  ;;  %p280_p4 = scmp.lt.s32.totalorder %s16_s10, %s16_s10 }
   0x9   :  { %p276_p3 = scmp.ne.s32.totalorder %s16_s10, %s275_s18  ;;  %p281_p5 = scmp.lt.s32.totalorder %s275_s18, %s275_s18 }
   0xb   :  { %p282_p6 = por %p281_p5, %p280_p4 }
   0xd   :  { %p283_p7 = pnand %p282_p6, %p276_p3 }
   0xf   :  { %286 = shalt.err (!%p283_p7)
}
  0x10   :  { %s314_s19 = smov 128   ;;  %s315_s20 = smov 8  }
  0x11   :  { %21 = dma.hbm_to_vmem [thread:$0]  %s382_s1, 512, %s16_s10, [#allocation5], %s314_s19, %s314_s19, %s315_s20  }
  0x12   :  { %309 = dma.done.wait [#allocation5], 512  }
  0x13   :  { %310 = vsyncadd [#allocation5], 4294966784  ;;  %v347_v0 = vld [vmem:[#allocation4] sm:$0xff]  ;;  %v349_v1 = vld [vmem:[#allocation4 + $0x10] sm:$0xff]  ;;  %v30_v4 = vlaneseq  ;;  %v44_v7 = vstv %s381_s0  ;;  %s316_s0 = smov [#allocation7]  }
  0x14   :  { %145 = vmax.xlane.f32.xlu0 %v347_v0  ;;  %149 = vmax.xlane.f32.xlu1 %v349_v1  ;;  %v353_v2 = vld [vmem:[#allocation4 + $0x8] sm:$0xff]  ;;  %v355_v3 = vld [vmem:[#allocation4 + $0x18] sm:$0xff]  ;;  %s198_s24 = sshll.u32 %s316_s0, 4  ;;  %s199_s24 = int_to_ptr.vmem [resolvable:$true] %s198_s24 }
  0x15   :  { %v36_v5 = vand.u32 127, %v30_v4  ;;  %v31_v15 = vshrl.u32 %v30_v4, 7  ;;  %s287_s25 = scalar_lea.vmem %s199_s24, 512  ;;  %p292_p9 = scmp.lt.s32.totalorder %s199_s24, %s199_s24 }
  0x16   :  { %p288_p8 = scmp.ne.s32.totalorder %s199_s24, %s287_s25  ;;  %p293_p10 = scmp.lt.s32.totalorder %s287_s25, %s287_s25 }
  0x17   :  { %v43_v6 = vmul.u32 2654435761, %v36_v5  ;;  %v33_v17 = vadd.s32 16, %v31_v15  ;;  %v57_v19 = vmul.u32 2246822519, %v31_v15  ;;  %v32_v20 = vadd.s32 8, %v31_v15 }
  0x18   :  { %147 = vmax.xlane.f32.xlu0 %v353_v2  ;;  %151 = vmax.xlane.f32.xlu1 %v355_v3  ;;  %v34_v22 = vadd.s32 24, %v31_v15  ;;  %p294_p11 = por %p293_p10, %p292_p9 }
  0x19   :  { %v45_v8 = vadd.s32 %v44_v7, %v43_v6  ;;  %v59_v21 = vmul.u32 2246822519, %v33_v17  ;;  %v58_v24 = vmul.u32 2246822519, %v32_v20 }
  0x1a   :  { %v60_v26 = vmul.u32 2246822519, %v34_v22  ;;  %p295_p12 = pnand %p294_p11, %p288_p8 }
  0x1b   :  { %v210_v9 = vshrl.u32 %v45_v8, 16 }
  0x1d   :  { %v48_v10 = vxor.u32 %v210_v9, %v45_v8 }
  0x1f   :  { %v49_v11 = vmul.u32 2146121005, %v48_v10 }
  0x21   :  { %v211_v12 = vshrl.u32 %v49_v11, 15 }
  0x23   :  { %v52_v13 = vxor.u32 %v211_v12, %v49_v11 }
  0x25   :  { %v53_v14 = vmul.u32 2221713035, %v52_v13 }
  0x27   :  { %v212_v16 = vshrl.u32 %v53_v14, 16 }
  0x29   :  { %v56_v18 = vxor.u32 %v212_v16, %v53_v14 }
  0x2b   :  { %v61_v23 = vxor.u32 %v57_v19, %v56_v18  ;;  %v63_v25 = vxor.u32 %v59_v21, %v56_v18  ;;  %v62_v28 = vxor.u32 %v58_v24, %v56_v18  ;;  %v64_v30 = vxor.u32 %v60_v26, %v56_v18 }
  0x2d   :  { %v213_v27 = vshrl.u32 %v61_v23, 16  ;;  %v215_v29 = vshrl.u32 %v63_v25, 16  ;;  %v214_v32 = vshrl.u32 %v62_v28, 16  ;;  %v216_v34 = vshrl.u32 %v64_v30, 16 }
  0x2f   :  { %v73_v31 = vxor.u32 %v213_v27, %v61_v23  ;;  %v75_v33 = vxor.u32 %v215_v29, %v63_v25  ;;  %v74_v36 = vxor.u32 %v214_v32, %v62_v28  ;;  %v76_v38 = vxor.u32 %v216_v34, %v64_v30 }
  0x31   :  { %v77_v35 = vmul.u32 2146121005, %v73_v31  ;;  %v79_v37 = vmul.u32 2146121005, %v75_v33 }
  0x32   :  { %v78_v40 = vmul.u32 2146121005, %v74_v36  ;;  %v80_v42 = vmul.u32 2146121005, %v76_v38 }
  0x33   :  { %v217_v39 = vshrl.u32 %v77_v35, 15  ;;  %v219_v41 = vshrl.u32 %v79_v37, 15 }
  0x34   :  { %v218_v44 = vshrl.u32 %v78_v40, 15  ;;  %v220_v46 = vshrl.u32 %v80_v42, 15 }
  0x35   :  { %v89_v43 = vxor.u32 %v217_v39, %v77_v35  ;;  %v91_v45 = vxor.u32 %v219_v41, %v79_v37 }
  0x36   :  { %v90_v48 = vxor.u32 %v218_v44, %v78_v40  ;;  %v92_v50 = vxor.u32 %v220_v46, %v80_v42 }
  0x37   :  { %v93_v47 = vmul.u32 2221713035, %v89_v43  ;;  %v95_v49 = vmul.u32 2221713035, %v91_v45 }
  0x38   :  { %v94_v52 = vmul.u32 2221713035, %v90_v48  ;;  %v96_v54 = vmul.u32 2221713035, %v92_v50 }
  0x39   :  { %v221_v51 = vshrl.u32 %v93_v47, 16  ;;  %v223_v53 = vshrl.u32 %v95_v49, 16 }
  0x3a   :  { %v222_v56 = vshrl.u32 %v94_v52, 16  ;;  %v224_v58 = vshrl.u32 %v96_v54, 16 }
  0x3b   :  { %v105_v55 = vxor.u32 %v221_v51, %v93_v47  ;;  %v107_v57 = vxor.u32 %v223_v53, %v95_v49 }
  0x3c   :  { %v106_v60 = vxor.u32 %v222_v56, %v94_v52  ;;  %v108_v62 = vxor.u32 %v224_v58, %v96_v54 }
  0x3d   :  { %v225_v59 = vshrl.u32 %v105_v55, 8  ;;  %v227_v61 = vshrl.u32 %v107_v57, 8 }
  0x3e   :  { %v226_v4 = vshrl.u32 %v106_v60, 8  ;;  %v228_v6 = vshrl.u32 %v108_v62, 8 }
  0x3f   :  { %v117_v63 = vcvt.s32.f32 %v225_v59  ;;  %v119_v5 = vcvt.s32.f32 %v227_v61 }
  0x40   :  { %v118_v8 = vcvt.s32.f32 %v226_v4  ;;  %v120_v10 = vcvt.s32.f32 %v228_v6 }
  0x41   :  { %v121_v7 = vmul.f32 5.9604645e-08, %v117_v63  ;;  %v123_v9 = vmul.f32 5.9604645e-08, %v119_v5 }
  0x42   :  { %v122_v12 = vmul.f32 5.9604645e-08, %v118_v8  ;;  %v124_v14 = vmul.f32 5.9604645e-08, %v120_v10 }
  0x43   :  { %v125_v11 = vadd.f32 1e-20, %v121_v7  ;;  %v127_v13 = vadd.f32 1e-20, %v123_v9 }
  0x44   :  { %v126_v15 = vadd.f32 1e-20, %v122_v12  ;;  %v128_v16 = vadd.f32 1e-20, %v124_v14 }
  0x45   :  { %233 = vlog2.f32 %v125_v11 }
  0x46   :  { %235 = vlog2.f32 %v127_v13 }
  0x47   :  { %237 = vlog2.f32 %v126_v15 }
  0x48   :  { %239 = vlog2.f32 %v128_v16 }
  0x4f   :  { %v234_v17 = vpop.eup %233 }
  0x50   :  { %v236_v18 = vpop.eup %235  ;;  %v130_v19 = vmul.f32 0.6931472, %v234_v17 }
  0x51   :  { %v238_v20 = vpop.eup %237  ;;  %v134_v21 = vmul.f32 0.6931472, %v236_v18 }
  0x52   :  { %v240_v22 = vpop.eup %239  ;;  %v137_v23 = vsub.f32 0.0, %v130_v19  ;;  %v132_v24 = vmul.f32 0.6931472, %v238_v20 }
  0x53   :  { %v139_v25 = vsub.f32 0.0, %v134_v21  ;;  %v136_v26 = vmul.f32 0.6931472, %v240_v22 }
  0x54   :  { %v141_v27 = vadd.f32 1e-20, %v137_v23  ;;  %v138_v28 = vsub.f32 0.0, %v132_v24 }
  0x55   :  { %v143_v31 = vadd.f32 1e-20, %v139_v25  ;;  %v140_v32 = vsub.f32 0.0, %v136_v26 }
  0x56   :  { %241 = vrcp.f32 %v141_v27  ;;  %v142_v37 = vadd.f32 1e-20, %v138_v28 }
  0x57   :  { %243 = vrcp.f32 %v143_v31  ;;  %v144_v40 = vadd.f32 1e-20, %v140_v32 }
  0xa1   :  { %v146_v29 = vpop.xlane.xlu0 %145  ;;  %v150_v30 = vpop.xlane.xlu1 %149 }
  0xa2   :  { %v153_v33 = vsub.f32 %v347_v0, %v146_v29  ;;  %v155_v34 = vsub.f32 %v349_v1, %v150_v30  ;;  %v242_v0 = vpop.eup %241 }
  0xa3   :  { %v244_v1 = vpop.eup %243 }
  0xa4   :  { %v157_v35 = vmul.f32 1.442695, %v153_v33  ;;  %v161_v36 = vmul.f32 1.442695, %v155_v34 }
  0xa5   :  { %v148_v38 = vpop.xlane.xlu0 %147  ;;  %v152_v39 = vpop.xlane.xlu1 %151 }
  0xa6   :  { %245 = vpow2.f32 %v157_v35  ;;  %v154_v41 = vsub.f32 %v353_v2, %v148_v38  ;;  %v156_v42 = vsub.f32 %v355_v3, %v152_v39 }
  0xa7   :  { %247 = vpow2.f32 %v161_v36 }
  0xa8   :  { %v159_v43 = vmul.f32 1.442695, %v154_v41  ;;  %v163_v44 = vmul.f32 1.442695, %v156_v42  ;;  %249 = vrcp.f32 %v142_v37 }
  0xa9   :  { %251 = vrcp.f32 %v144_v40 }
  0xaa   :  { %253 = vpow2.f32 %v159_v43 }
  0xab   :  { %255 = vpow2.f32 %v163_v44 }
  0xb0   :  { %v246_v45 = vpop.eup %245 }
  0xb1   :  { %v248_v46 = vpop.eup %247  ;;  %v169_v47 = vmul.f32 %v246_v45, %v242_v0 }
  0xb2   :  { %v250_v48 = vpop.eup %249  ;;  %v171_v50 = vmul.f32 %v248_v46, %v244_v1 }
  0xb3   :  { %v252_v49 = vpop.eup %251  ;;  %173 = vadd.xlane.f32.xlu0 %v169_v47 }
  0xb4   :  { %v254_v51 = vpop.eup %253 }
  0xb5   :  { %v256_v2 = vpop.eup %255  ;;  %v170_v52 = vmul.f32 %v254_v51, %v250_v48 }
  0xb6   :  { %v172_v3 = vmul.f32 %v256_v2, %v252_v49 }
  0xb7   :  { %177 = vadd.xlane.f32.xlu0 %v171_v50  ;;  %175 = vadd.xlane.f32.xlu1 %v170_v52 }
  0xbb   :  { %179 = vadd.xlane.f32.xlu1 %v172_v3 }
 0x140   :  { %v174_v53 = vpop.xlane.xlu0 %173 }
 0x141   :  { %257 = vrcp.f32 %v174_v53 }
 0x144   :  { %v176_v54 = vpop.xlane.xlu1 %175  ;;  %v178_v55 = vpop.xlane.xlu0 %177 }
 0x145   :  { %259 = vrcp.f32 %v176_v54 }
 0x146   :  { %261 = vrcp.f32 %v178_v55 }
 0x148   :  { %v180_v56 = vpop.xlane.xlu1 %179 }
 0x149   :  { %263 = vrcp.f32 %v180_v56 }
 0x14b   :  { %v258_v57 = vpop.eup %257 }
 0x14c   :  { %v185_v58 = vmul.f32 %v258_v57, %v169_v47 }
 0x14e   :  { %189 = vst [vmem:[#allocation7] sm:$0xff] %v185_v58 }
 0x14f   :  { %v260_v59 = vpop.eup %259 }
 0x150   :  { %v262_v60 = vpop.eup %261  ;;  %v186_v61 = vmul.f32 %v260_v59, %v170_v52 }
 0x151   :  { %v187_v62 = vmul.f32 %v262_v60, %v171_v50 }
 0x152   :  { %190 = vst [vmem:[#allocation7 + $0x8] sm:$0xff] %v186_v61 }
 0x153   :  { %v264_v63 = vpop.eup %263  ;;  %191 = vst [vmem:[#allocation7 + $0x10] sm:$0xff] %v187_v62 }
 0x154   :  { %v188_v4 = vmul.f32 %v264_v63, %v172_v3 }
 0x156   :  { %192 = vst [vmem:[#allocation7 + $0x18] sm:$0xff] %v188_v4 }
 0x157   :  { %298 = shalt.err (!%p295_p12)
}
 0x158   :  { %s299_s28 = scalar_lea.hbm %s383_s2, 512 }
 0x159   :  { %p300_p13 = scmp.ne.s32.totalorder %s383_s2, %s299_s28  ;;  %p303_p0 = scmp.lt.u32.totalorder %s299_s28, %s383_s2 }
 0x15b   :  { %p305_p1 = pnand %p303_p0, %p300_p13 }
 0x15d   :  { %308 = shalt.err (!%p305_p1)
}
 0x15e   :  { %204 = dma.vmem_to_hbm [thread:$0]  %s199_s24, 512, %s383_s2, [#allocation6], %s314_s19, %s314_s19, %s315_s20  }
 0x15f   :  { %311 = dma.done.wait [#allocation6], 512  }
 0x160   :  { %312 = vsyncadd [#allocation6], 4294966784 }
 0x161   :  { %208 = vsyncpa [#allocation5], 1 }
 0x162   :  { %209 = vsyncpa [#allocation6], 1 }

</bundles_post_ra>
